<compile_context>
chip_gen: v7x
topology: tpu7x:2x2x1
jax: 0.10.0
libtpu: 0.0.40
codegen_flags: <defaults>
</compile_context>

<pallas_src>
import functools

import jax
import jax.numpy as jnp
from jax.experimental import pallas as pl
from jax.experimental.pallas import tpu as pltpu

_LANE = 128


def _gated_conv_kernel(w_ref, x_ref, out_ref):
    # w_ref:   (2*Cout, KCp)  fused [filter; 0.5*gate] weights, bias col folded in.
    # x_ref:   (KCp, THW)     im2col'd input block; lanes = spatial (H*W) axis.
    # out_ref: (Cout, THW)
    cout = out_ref.shape[0]
    acc = jax.lax.dot_general(
        w_ref[...], x_ref[...],
        dimension_numbers=(((1,), (0,)), ((), ())),
        preferred_element_type=jnp.float32)            # (2*Cout, THW) f32
    # filter rows: tanh(a);  gate rows: sigmoid(a) = 0.5*tanh(a/2) + 0.5,
    # with the /2 pre-folded into the gate weights/bias by the wrapper, so the
    # whole accumulator goes through a single tanh (EUP).
    t = jnp.tanh(acc)
    out_ref[...] = (t[:cout] * (0.5 * t[cout:] + 0.5)).astype(out_ref.dtype)


def _choose_tile(hw, batch, max_tm, target_total_steps=4):
    """Lane-dense tile (multiple of 128) along H*W within one batch element.

    Targets >= `target_total_steps` total grid steps (so megacore + the DMA
    pipeline have work) while keeping lane padding below one 128-block/step.
    """
    blocks = -(-hw // _LANE)                                  # cdiv(hw, 128)
    per_batch = max(1, -(-target_total_steps // max(batch, 1)))
    n_steps = max(per_batch, -(-(blocks * _LANE) // max_tm))
    n_steps = min(n_steps, blocks)
    return _LANE * (-(-blocks // n_steps))


@functools.partial(jax.jit,
                   static_argnames=("compute_dtype", "out_dtype", "max_tm"))
def t_branch_forward(x, wf, bf, wg, bg, *, compute_dtype=jnp.bfloat16,
                     out_dtype=None, max_tm=32768):
    """x: (B, C_in, H, W) NCHW.  wf/wg: (C_out, C_in, 1, K) PyTorch layout.
    bf/bg: (C_out,).  Returns (B, C_out, H, W).

    out_dtype defaults to x.dtype (PyTorch-equivalent semantics); pass
    jnp.bfloat16 to halve the kernel's HBM write traffic when the consumer
    runs in bf16 anyway.
    """
    B, Cin, H, W = x.shape
    Cout, _, _, K = wf.shape
    out_dtype = x.dtype if out_dtype is None else out_dtype

    # PyTorch padding='same' (stride 1): total = K-1, left = total//2.
    # TODO(synk): verify the even-K split against torch's 'same' convention
    # before relying on even kernel sizes (odd K, the common case, matches).
    total_pad = K - 1
    pad_l = total_pad // 2
    pad_r = total_pad - pad_l

    HW = H * W
    THW = _choose_tile(HW, B, max_tm)
    HWp = pl.cdiv(HW, THW) * THW

    # ---- wrapper-side packing (one fused XLA producer, already NCHW-major) --
    xc = x.astype(compute_dtype)
    x_pad = jnp.pad(xc, ((0, 0), (0, 0), (0, 0), (pad_l, pad_r)))   # (B,Cin,H,W+K-1)
    # im2col: x2[b, k*Cin + ci, h*W + w] = x_pad[b, ci, h, w + k]
    taps = [x_pad[:, :, :, k:k + W] for k in range(K)]              # (B,Cin,H,W) each
    x2 = jnp.stack(taps, axis=1).reshape(B, K * Cin, HW)            # (B, K*Cin, HW)

    kc = K * Cin + 1                    # +1 ones row -> bias folded into the dot
    kc_pad = ((kc + 15) // 16) * 16     # bf16 sublane packing (multiple of 16)
    x2 = jnp.concatenate([x2, jnp.ones((B, 1, HW), compute_dtype)], axis=1)
    x2 = jnp.pad(x2, ((0, 0), (0, kc_pad - kc), (0, HWp - HW)))

    # Fused weights: rows = [filter; 0.5*gate] output channels,
    # cols = (k, ci) taps + bias column + zero padding.
    def _pack_w(w, scale):                                          # (Cout,Cin,1,K)
        return (scale * jnp.transpose(w[:, :, 0, :], (0, 2, 1))).reshape(Cout,
                                                                         K * Cin)

    # sigmoid(a) = 0.5*tanh(a/2) + 0.5: fold the /2 into the gate weights/bias.
    w_cat = jnp.concatenate([_pack_w(wf, 1.0), _pack_w(wg, 0.5)], axis=0)
    b_cat = jnp.concatenate([bf, 0.5 * bg], axis=0).reshape(2 * Cout, 1)
    w_full = jnp.concatenate(
        [w_cat, b_cat, jnp.zeros((2 * Cout, kc_pad - kc), w_cat.dtype)], axis=1)
    w_full = w_full.astype(compute_dtype)                           # (2*Cout, kc_pad)

    grid = (B, HWp // THW)
    itemsize_c = jnp.dtype(compute_dtype).itemsize
    cost = pl.CostEstimate(
        flops=2 * (2 * Cout) * kc * B * HW,
        transcendentals=2 * Cout * B * HW,
        bytes_accessed=(B * kc_pad * HWp * itemsize_c
                        + 2 * Cout * kc_pad * itemsize_c
                        + B * Cout * HWp * jnp.dtype(out_dtype).itemsize))
    # NOTE: MXU utilisation is intrinsically tiny at this Cin/Cout/K (16-deep
    # contraction); the kernel is HBM-bound, so matmul-shape tuning cannot help.

    out = pl.pallas_call(
        _gated_conv_kernel,
        out_shape=jax.ShapeDtypeStruct((B, Cout, HWp), out_dtype),
        grid_spec=pltpu.PrefetchScalarGridSpec(
            num_scalar_prefetch=0,
            grid=grid,
            in_specs=[
                pl.BlockSpec((2 * Cout, kc_pad), lambda b, i: (0, 0)),
                pl.BlockSpec((None, kc_pad, THW), lambda b, i: (b, 0, i)),
            ],
            out_specs=pl.BlockSpec((None, Cout, THW), lambda b, i: (b, 0, i)),
        ),
        compiler_params=pltpu.CompilerParams(
            dimension_semantics=("parallel", "parallel")),
        cost_estimate=cost,
    )(w_full, x2)

    if HWp != HW:
        out = out[:, :, :HW]
    return out.reshape(B, Cout, H, W)        # metadata-only when HWp == HW


def _reference(x, wf, bf, wg, bg, compute_dtype=jnp.bfloat16):
    """Plain-JAX reference with the same low-precision operand rounding
    (otherwise exact math) for a sanity check of the Pallas kernel."""
    f32 = jnp.float32
    B, Cin, H, W = x.shape
    Cout, _, _, K = wf.shape
    pad_l = (K - 1) // 2
    pad_r = (K - 1) - pad_l

    xc = x.astype(compute_dtype).astype(f32)
    x_pad = jnp.pad(xc, ((0, 0), (0, 0), (0, 0), (pad_l, pad_r)))

    def conv(w, b):
        wk = w.astype(compute_dtype).astype(f32)
        bk = b.astype(compute_dtype).astype(f32)
        acc = jnp.zeros((B, Cout, H, W), f32)
        for k in range(K):
            acc = acc + jnp.einsum("bchw,oc->bohw",
                                   x_pad[:, :, :, k:k + W], wk[:, :, 0, k])
        return acc + bk.reshape(1, Cout, 1, 1)

    return jnp.tanh(conv(wf, bf)) * jax.nn.sigmoid(conv(wg, bg))


if __name__ == "__main__":
    # Small shapes consistent with the module: NCHW input, kernel (1, K).
    B, C_IN, C_OUT, H, W, K = 2, 4, 8, 16, 16, 3

    key = jax.random.PRNGKey(0)
    kx, kwf, kbf, kwg, kbg = jax.random.split(key, 5)

    x = jax.random.normal(kx, (B, C_IN, H, W), dtype=jnp.float32)

    # Deterministic parameter init (uniform ~ PyTorch's fan_in scaling).
    fan_in = C_IN * 1 * K
    bound = 1.0 / jnp.sqrt(jnp.float32(fan_in))
    wf = jax.random.uniform(kwf, (C_OUT, C_IN, 1, K), jnp.float32, -bound, bound)
    bf = jax.random.uniform(kbf, (C_OUT,), jnp.float32, -bound, bound)
    wg = jax.random.uniform(kwg, (C_OUT, C_IN, 1, K), jnp.float32, -bound, bound)
    bg = jax.random.uniform(kbg, (C_OUT,), jnp.float32, -bound, bound)

    out = t_branch_forward(x, wf, bf, wg, bg)
    out = jax.block_until_ready(out)

    ref = _reference(x, wf, bf, wg, bg)
    assert out.shape == (B, C_OUT, H, W)
    # Kernel uses bf16 MXU operands (f32 accumulation); sigmoid is computed via
    # the exact identity sigmoid(a) = 0.5*tanh(a/2)+0.5, so the residual error
    # is only bf16 operand rounding + accumulation order.
    assert jnp.allclose(out, ref, atol=1e-2, rtol=1e-2), (
        float(jnp.max(jnp.abs(out - ref))))

    print("KERNEL_OK")
</pallas_src>

<mosaic_0001>
module attributes {stable_mosaic.version = 11 : i64} {
  func.func @_gated_conv_kernel(%arg0: i32, %arg1: i32, %arg2: memref<16x16xbf16, #tpu.memory_space<vmem>>, %arg3: memref<1x16x128xbf16, #tpu.memory_space<vmem>>, %arg4: memref<1x8x128xf32, #tpu.memory_space<vmem>>) attributes {dimension_semantics = [#tpu.dimension_semantics<parallel>, #tpu.dimension_semantics<parallel>], iteration_bounds = array<i64: 2, 2>, scalar_prefetch = 0 : i64, scratch_operands = 0 : i64, tpu.core_type = #tpu.core_type<tc>, window_params = [{pipeline_mode = #tpu.pipeline_mode<synchronous>, transform_indices = @transform_0, window_bounds = array<i64: 16, 16>}, {transform_indices = @transform_1, window_bounds = array<i64: 1, 16, 128>}, {transform_indices = @transform_2, window_bounds = array<i64: 1, 8, 128>}]} {
    %c0 = arith.constant 0 : index
    %c0_0 = arith.constant 0 : index
    %0 = vector.load %arg2[%c0, %c0_0] : memref<16x16xbf16, #tpu.memory_space<vmem>>, vector<16x16xbf16>
    %c0_1 = arith.constant 0 : index
    %c0_2 = arith.constant 0 : index
    %c0_3 = arith.constant 0 : index
    %1 = vector.load %arg3[%c0_1, %c0_2, %c0_3] : memref<1x16x128xbf16, #tpu.memory_space<vmem>>, vector<1x16x128xbf16>
    %2 = vector.shape_cast %1 : vector<1x16x128xbf16> to vector<16x128xbf16>
    %cst = arith.constant dense<0.000000e+00> : vector<16x128xf32>
    %3 = tpu.matmul %0, %2, %cst {dimension_numbers = #tpu.dot_dimension_numbers<[1], [0], [0], [1], [0, 0, 1, 1], [], []>} : vector<16x16xbf16>, vector<16x128xbf16>, vector<16x128xf32> -> vector<16x128xf32>
    %4 = math.tanh %3 : vector<16x128xf32>
    %5 = vector.extract_strided_slice %4 {offsets = [0, 0], sizes = [8, 128], strides = [1, 1]} : vector<16x128xf32> to vector<8x128xf32>
    %6 = vector.extract_strided_slice %4 {offsets = [8, 0], sizes = [8, 128], strides = [1, 1]} : vector<16x128xf32> to vector<8x128xf32>
    %cst_4 = arith.constant 5.000000e-01 : f32
    %7 = vector.broadcast %cst_4 : f32 to vector<8x128xf32>
    %8 = arith.mulf %7, %6 : vector<8x128xf32>
    %cst_5 = arith.constant 5.000000e-01 : f32
    %9 = vector.broadcast %cst_5 : f32 to vector<8x128xf32>
    %10 = arith.addf %8, %9 : vector<8x128xf32>
    %11 = arith.mulf %5, %10 : vector<8x128xf32>
    %c0_6 = arith.constant 0 : index
    %c0_7 = arith.constant 0 : index
    %c0_8 = arith.constant 0 : index
    %12 = vector.load %arg4[%c0_6, %c0_7, %c0_8] : memref<1x8x128xf32, #tpu.memory_space<vmem>>, vector<1x8x128xf32>
    %13 = vector.shape_cast %12 : vector<1x8x128xf32> to vector<8x128xf32>
    %14 = vector.shape_cast %11 : vector<8x128xf32> to vector<1x8x128xf32>
    tpu.vector_store %arg4[%c0_6, %c0_7, %c0_8], %14 {strides = array<i32>} : memref<1x8x128xf32, #tpu.memory_space<vmem>>, vector<1x8x128xf32>,
    return
  }
  func.func @transform_0(%arg0: i32, %arg1: i32) -> (i32, i32) {
    %c0_i32 = arith.constant 0 : i32
    %c0_i32_0 = arith.constant 0 : i32
    %c0_i32_1 = arith.constant 0 : i32
    return %c0_i32, %c0_i32_0 : i32, i32
  }
  func.func @transform_1(%arg0: i32, %arg1: i32) -> (i32, i32, i32) {
    %c0_i32 = arith.constant 0 : i32
    %c0_i32_0 = arith.constant 0 : i32
    return %arg0, %c0_i32, %arg1 : i32, i32, i32
  }
  func.func @transform_2(%arg0: i32, %arg1: i32) -> (i32, i32, i32) {
    %c0_i32 = arith.constant 0 : i32
    %c0_i32_0 = arith.constant 0 : i32
    return %arg0, %c0_i32, %arg1 : i32, i32, i32
  }
}

</mosaic_0001>

<bundles_post_ra>
// kernel: t_branch_forward.1
= control target key start
LH: loop header
LB: loop body
LE: loop exit
PB: predicated region body
PF: predicated region fallthrough
CT: control target
= control target key end

     0   :  { %s529_s9 = smov 0   ;;  %s531_s10 = smov 0   ;;  %s623_s0 = inlined_call_operand.vmem [shape: bf16[16,16], index: 0, kind: input, shape index: {}]   ;;  %s624_s1 = inlined_call_operand.vmem [shape: bf16[2,16,256], index: 1, kind: input, shape index: {}]   ;;  %s625_s2 = inlined_call_operand.vmem [shape: f32[2,8,256], index: 2, kind: output, shape index: {}]  }
   0x1   :  { %s533_s11 = smov 0   ;;  %s535_s12 = smov 0  }
   0x2   :  { %s537_s13 = smov 0   ;;  %s539_s14 = smov 0  }
   0x3   :  { %s541_s15 = smov 0  }
   0x4 LB: > { %s21_s16 = sadd.s32 1, %s502_s13  ;;  %s24_s17 = sadd.s32 1, %s506_s14  ;;  %s510_s15 = sphi %s541_s15, %s12_s15   ;;  %s506_s14 = sphi %s539_s14, %s631_s14   ;;  %s502_s13 = sphi %s537_s13, %s630_s13   ;;  %s498_s12 = sphi %s535_s12, %s629_s12   ;;  %s494_s11 = sphi %s533_s11, %s628_s11   ;;  %s490_s10 = sphi %s531_s10, %s627_s10   ;;  %s486_s9 = sphi %s529_s9, %s626_s9  }
   0x5   : > { %p22_p0 = scmp.ge.s32.totalorder %s21_s16, 2  ;;  %p61_p1 = scmp.ne.s32.totalorder %s490_s10, %s486_s9 }
   0x6   : > { %p62_p2 = scmp.eq.s32.totalorder %s510_s15, 0  ;;  %s54_s21 = sadd.s32 1, %s490_s10 }
   0x7   : > { %s633_s16 = smov (%p22_p0, %s21_s16), 0  ;;  %s635_s17 = smov (!%p22_p0, %s24_s17), %s506_s14 }
   0x8   : > { %p63_p3 = por %p62_p2, %p61_p1  ;;  %p26_p4 = scmp.ge.s32.totalorder %s635_s17, 2 }
   0x9   : > { %s50_s18 = ssub.s32 %s502_s13, %s633_s16  ;;  %p371_p6 = scmp.ge.s32.totalorder %s510_s15, 4 }
   0xa   : > { %s637_s17 = smov (%p26_p4, %s635_s17), 0 }
   0xb   : > { %s49_s19 = ssub.s32 %s506_s14, %s637_s17  ;;  %118 = sbr.rel (%p371_p6) target bundleno = 25 (0x19), region = 20 }
   0xc   : > { %s51_s20 = sor.u32 %s50_s18, %s49_s19 }
   0xd   : > { %p52_p5 = scmp.eq.s32.totalorder %s51_s20, 0 }
   0xf   : > { %s580_s22 = scalar_select %p52_p5, %s490_s10, %s54_s21  }
  0x12   : > { %121 = sbr.rel (!%p63_p3) target bundleno = 25 (0x19), region = 24  ;;  %s123_s23 = sand.u32 (%p63_p3), 1, %s490_s10  }
  0x13   : > { %s373_s24 = sshll.u32 (%p63_p3), %s506_s14, 2  ;;  %s372_s25 = sshll.u32 (%p63_p3), %s123_s23, 3 }
  0x14   : > { %s127_s26 = sadd.s32 (%p63_p3), %s502_s13, %s373_s24  ;;  %s125_s3 = scalar_lea.vmem (%p63_p3), [#allocation2], %s372_s25 }
  0x15   : > { %s374_s27 = sshll.u32 (%p63_p3), %s127_s26, 2 }
  0x16   : > { %s129_s30 = scalar_lea.vmem (%p63_p3), %s624_s1, %s374_s27 }
  0x17   : > { %v145_v0 = vld [vmem:[%s129_s30] sm:$0xf] (%p63_p3)  ;;  %v147_v1 = vld [vmem:[%s129_s30 + $0x8] sm:$0xf] (%p63_p3) }
  0x18   : > { %146 = vst [vmem:[%s125_s3] sm:$0xf] (%p63_p3), %v145_v0  ;;  %148 = vst [vmem:[%s125_s3 + $0x4] sm:$0xf] (%p63_p3), %v147_v1 }
  0x19 PF: > { %p375_p7 = scmp.ge.s32.totalorder %s510_s15, 1  ;;  %p174_p8 = scmp.lt.s32.totalorder %s510_s15, 5 }
  0x1b   : > { %p175_p9 = pnand %p375_p7, %p174_p8 }
  0x1c   : > { %s181_s4 = sand.u32 (!%p175_p9), 1, %s486_s9   ;;  %v512_v2 = vmov (!%p175_p9), 0.0   ;;  %vm513_vm0 = vmmov (!%p175_p9), 0   ;;  %v451_v4 = vld [vmem:[%s623_s0] sm:$0xff] (!%p175_p9)   ;;  %vm229_vm1 = vcmask (!%p175_p9), 130048   ;;  %p205_p10 = scmp.lt.s32.totalorder (!%p175_p9), %s498_s12, 1 }
  0x1d   : > { %178 = sbr.rel (%p175_p9) target bundleno = 267 (0x10b), region = 65  ;;  %386 = vmatprep.subr.bf16.mxu0 (!%p175_p9), %v512_v2  ;;  %s376_s5 = sshll.u32 (!%p175_p9), %s181_s4, 3  ;;  %388 = vmatprep.mubr.msk.bf16.mxu0 (!%p175_p9), %vm513_vm0, %v512_v2 }
  0x1e   : > { %s183_s6 = scalar_lea.vmem (!%p175_p9), [#allocation2], %s376_s5  ;;  %p207_p11 = scmp.lt.s32.totalorder (!%p175_p9), %s494_s11, 1 }
  0x1f   : > { %v450_v3 = vld [vmem:[%s183_s6] sm:$0xff] (!%p175_p9)  }
  0x20   : > { %387 = vmatpush3.bf16.msra.mxu0 (!%p175_p9), %v450_v3 }
  0x23   : > { %389 = vmatmul.mubr.msk.bf16.vlgmr.msra.gmra.mrb[0].mxu0 (!%p175_p9), %vm229_vm1, %v451_v4 }
  0x24   : > { %s639_s12 = smov (!%p205_p10, %s498_s12), 1  ;;  %s641_s11 = smov (!%p207_p11, %s494_s11), 1 }
  0x25   : > { %s377_s9 = sshll.u32 %s639_s12, 1 }
  0x26   : > { %s210_s18 = sadd.s32 %s377_s9, %s641_s11 }
  0x27   : > { %s378_s19 = sshll.u32 %s210_s18, 3 }
  0x28   : > { %s212_s23 = scalar_lea.vmem %s625_s2, %s378_s19 }
  0xf6   : > { %v267_v5 = vpop.f32.mrb[0].mxu0 }
  0xf7   : > { %v390_v6 = vpop.f32.mrb[1].mxu0 }
  0xf8   : > { %v270_v7 = vpop.f32.mrb[2].mxu0 }
  0xf9   : > { %452 = vtanh.f32 %v270_v7  ;;  %v391_v8 = vpop.f32.mrb[3].mxu0 }
  0xfa   : > { %454 = vtanh.f32 %v267_v5 }
 0x103   : > { %v453_v9 = vpop.eup %452 }
 0x104   : > { %v276_v10 = vmul.f32 0.5, %v453_v9  ;;  %v455_v12 = vpop.eup %454 }
 0x106   : > { %v277_v11 = vadd.f32 0.5, %v276_v10 }
 0x108   : > { %v278_v13 = vmul.f32 %v455_v12, %v277_v11 }
 0x10a   : > { %279 = vst [vmem:[%s212_s23] sm:$0xff] %v278_v13 }
 0x10b PF: > { %s12_s15 = sadd.s32 1, %s510_s15   ;;  %s626_s9 = smov %s490_s10 }
 0x10c   : > { %p9_p12 = scmp.ge.s32.totalorder %s12_s15, 6   ;;  %s627_s10 = smov %s580_s22 }
 0x10d   : > { %s628_s11 = smov %s502_s13  ;;  %s629_s12 = smov %s506_s14 }
 0x10e   : > { %s630_s13 = smov %s633_s16  ;;  %s631_s14 = smov %s637_s17 }
 0x10f   :  { %11 = sbr.rel (!%p9_p12) target bundleno = 4 (0x4), region = 104 }

</bundles_post_ra>
